<compile_context>
chip_gen: v5e
topology: v5e:2x2
jax: 0.10.0
libtpu: 0.0.40
codegen_flags: <defaults>
</compile_context>

<pallas_src>
import jax
import jax.numpy as jnp
from jax.experimental import pallas as pl
from jax.experimental.pallas import tpu as pltpu


# ----------------------------- Pallas kernel ------------------------------- #
def _lstm_kernel(x_ref, wih_ref, whh_ref, b_ref, scale_ref, abias_ref,   # in
                 out_ref, hn_ref, cn_ref):                               # out
    Bp, H = hn_ref.shape
    T = x_ref.shape[0] // Bp

    # Input projection for every timestep in one MXU push, bias folded in once.
    #   x_ref: (T*Bp, D), wih_ref: (D, 4H), b_ref: (1, 4H)  ->  xg: (T*Bp, 4H)
    xg = (jnp.dot(x_ref[...], wih_ref[...], preferred_element_type=jnp.float32)
          + b_ref[...])

    whh = whh_ref[...]                                  # (H, 4H), held in vregs

    # Hoisted lane constants for the fused activation (broadcast once, outside
    # the loop — JAX does not CSE broadcast_in_dim).
    #   scale = 0.5 on i/f/o lanes, 1.0 on g lanes
    #   abias = 0.5 on i/f/o lanes, 0.0 on g lanes
    scale = jnp.broadcast_to(scale_ref[...], (Bp, 4 * H))
    abias = jnp.broadcast_to(abias_ref[...], (Bp, 4 * H))

    h = jnp.zeros((Bp, H), jnp.float32)
    c = jnp.zeros((Bp, H), jnp.float32)
    hs = []

    # Fully unrolled recurrence (T=8): static sublane/lane slices everywhere.
    for t in range(T):
        gates = xg[t * Bp:(t + 1) * Bp, :] + jnp.dot(
            h, whh, preferred_element_type=jnp.float32)        # (Bp, 4H)

        # sigmoid(x) = 0.5*tanh(x/2)+0.5 on i/f/o lanes, tanh(x) on g lanes:
        # ONE full-vreg EUP tanh per step instead of 3 sigmoids + 1 tanh.
        act = jnp.tanh(gates * scale) * scale + abias          # (Bp, 4H)

        i = act[:, 0 * H:1 * H]
        f = act[:, 1 * H:2 * H]
        g = act[:, 2 * H:3 * H]
        o = act[:, 3 * H:4 * H]

        c = f * c + i * g
        h = o * jnp.tanh(c)
        hs.append(h)

    # Coalesced, lane-dense output store: (Bp, T*H) = (8, 256) in one shot.
    out_ref[...] = jnp.concatenate(hs, axis=1).astype(out_ref.dtype)
    hn_ref[...] = h.astype(hn_ref.dtype)
    cn_ref[...] = c.astype(cn_ref.dtype)


# ------------------------------ JAX wrapper -------------------------------- #
def lstm_encoder_forward(x, w_ih, w_hh, b_ih, b_hh):
    """x: (T, B, D) f32; w_ih: (4H, D); w_hh: (4H, H); b_*: (4H,)."""
    T, B, D = x.shape
    H = w_hh.shape[1]

    # Pad batch to a full 8-sublane tile (zero rows; recurrence is row-wise
    # independent, padded rows are dropped below).
    Bp = ((B + 7) // 8) * 8
    x_pad = jnp.zeros((T, Bp, D), x.dtype).at[:, :B, :].set(x)
    x2d = x_pad.reshape(T * Bp, D)                      # (T*Bp, D)

    # Fused, pre-transposed weights; PyTorch row order i,f,g,o maps directly
    # onto the 4H lane axis.
    wih_f = w_ih.T                                      # (D, 4H)
    whh_f = w_hh.T                                      # (H, 4H)
    b_f = (b_ih + b_hh).reshape(1, 4 * H)               # (1, 4H)

    # Lane constants for the fused sigmoid/tanh activation.
    ones_h = jnp.ones((H,), jnp.float32)
    half_h = 0.5 * ones_h
    zero_h = jnp.zeros((H,), jnp.float32)
    act_scale = jnp.concatenate([half_h, half_h, ones_h, half_h]).reshape(1, 4 * H)
    act_bias = jnp.concatenate([half_h, half_h, zero_h, half_h]).reshape(1, 4 * H)

    out_shapes = (
        jax.ShapeDtypeStruct((Bp, T * H), x.dtype),     # packed lstm_out
        jax.ShapeDtypeStruct((Bp, H), x.dtype),         # h_n (layer 0, padded)
        jax.ShapeDtypeStruct((Bp, H), x.dtype),         # c_n (layer 0, padded)
    )

    grid_spec = pltpu.PrefetchScalarGridSpec(
        num_scalar_prefetch=0,
        grid=(1,),                                      # single invocation
        in_specs=[
            pl.BlockSpec((T * Bp, D), lambda i: (0, 0)),      # x (all steps)
            pl.BlockSpec((D, 4 * H), lambda i: (0, 0)),       # W_ih fused
            pl.BlockSpec((H, 4 * H), lambda i: (0, 0)),       # W_hh fused
            pl.BlockSpec((1, 4 * H), lambda i: (0, 0)),       # fused bias
            pl.BlockSpec((1, 4 * H), lambda i: (0, 0)),       # act scale lanes
            pl.BlockSpec((1, 4 * H), lambda i: (0, 0)),       # act bias lanes
        ],
        out_specs=[
            pl.BlockSpec((Bp, T * H), lambda i: (0, 0)),      # packed lstm_out
            pl.BlockSpec((Bp, H), lambda i: (0, 0)),          # h_n
            pl.BlockSpec((Bp, H), lambda i: (0, 0)),          # c_n
        ],
    )

    out2d, h_n, c_n = pl.pallas_call(
        _lstm_kernel,
        out_shape=out_shapes,
        grid_spec=grid_spec,
        compiler_params=pltpu.CompilerParams(
            dimension_semantics=("arbitrary",)),        # recurrence is sequential
    )(x2d, wih_f, whh_f, b_f, act_scale, act_bias)

    # Unpack lane-dense slab (Bp, T*H) -> (T, B, H); drop padded batch rows.
    lstm_out = out2d.reshape(Bp, T, H).transpose(1, 0, 2)[:, :B, :]
    h_n = h_n[:B]
    c_n = c_n[:B]

    # nn.LSTM returns hidden as (num_layers, B, H)
    return lstm_out, (h_n[None, :, :], c_n[None, :, :])


# ------------------------- Pure-JAX reference ------------------------------ #
def lstm_encoder_ref(x, w_ih, w_hh, b_ih, b_hh):
    T, B, D = x.shape
    H = w_hh.shape[1]

    def step(carry, x_t):
        h, c = carry
        gates = x_t @ w_ih.T + h @ w_hh.T + b_ih + b_hh
        i, f, g, o = jnp.split(gates, 4, axis=-1)
        i, f, o = jax.nn.sigmoid(i), jax.nn.sigmoid(f), jax.nn.sigmoid(o)
        g = jnp.tanh(g)
        c = f * c + i * g
        h = o * jnp.tanh(c)
        return (h, c), h

    init = (jnp.zeros((B, H), x.dtype), jnp.zeros((B, H), x.dtype))
    (h_n, c_n), ys = jax.lax.scan(step, init, x)
    return ys, (h_n[None], c_n[None])


# --------------------------------- main ------------------------------------ #
if __name__ == "__main__":
    T, B = 8, 2          # seq_len, batch
    input_size = 4
    hidden_size = 32
    num_layers = 1       # module default

    key = jax.random.PRNGKey(0)
    k_x, k_wih, k_whh, k_bih, k_bhh = jax.random.split(key, 5)

    # deterministic parameter init, PyTorch-style U(-1/sqrt(H), 1/sqrt(H))
    bound = 1.0 / jnp.sqrt(hidden_size)
    w_ih = jax.random.uniform(k_wih, (4 * hidden_size, input_size),
                              jnp.float32, -bound, bound)
    w_hh = jax.random.uniform(k_whh, (4 * hidden_size, hidden_size),
                              jnp.float32, -bound, bound)
    b_ih = jax.random.uniform(k_bih, (4 * hidden_size,),
                              jnp.float32, -bound, bound)
    b_hh = jax.random.uniform(k_bhh, (4 * hidden_size,),
                              jnp.float32, -bound, bound)

    x = jax.random.normal(k_x, (T, B, input_size), jnp.float32)

    lstm_out, (h_n, c_n) = lstm_encoder_forward(x, w_ih, w_hh, b_ih, b_hh)
    jax.block_until_ready((lstm_out, h_n, c_n))

    ref_out, (ref_h, ref_c) = lstm_encoder_ref(x, w_ih, w_hh, b_ih, b_hh)

    assert lstm_out.shape == (T, B, hidden_size)
    assert h_n.shape == (num_layers, B, hidden_size)
    assert c_n.shape == (num_layers, B, hidden_size)
    assert jnp.allclose(lstm_out, ref_out, atol=1e-5, rtol=1e-5)
    assert jnp.allclose(h_n, ref_h, atol=1e-5, rtol=1e-5)
    assert jnp.allclose(c_n, ref_c, atol=1e-5, rtol=1e-5)

    print("KERNEL_OK")
</pallas_src>

<mosaic_0001>
module attributes {stable_mosaic.version = 11 : i64} {
  func.func @_lstm_kernel(%arg0: i32, %arg1: memref<64x4xf32, #tpu.memory_space<vmem>>, %arg2: memref<4x128xf32, #tpu.memory_space<vmem>>, %arg3: memref<32x128xf32, #tpu.memory_space<vmem>>, %arg4: memref<1x128xf32, #tpu.memory_space<vmem>>, %arg5: memref<1x128xf32, #tpu.memory_space<vmem>>, %arg6: memref<1x128xf32, #tpu.memory_space<vmem>>, %arg7: memref<8x256xf32, #tpu.memory_space<vmem>>, %arg8: memref<8x32xf32, #tpu.memory_space<vmem>>, %arg9: memref<8x32xf32, #tpu.memory_space<vmem>>) attributes {dimension_semantics = [#tpu.dimension_semantics<arbitrary>], iteration_bounds = array<i64: 1>, scalar_prefetch = 0 : i64, scratch_operands = 0 : i64, tpu.core_type = #tpu.core_type<tc>, window_params = [{pipeline_mode = #tpu.pipeline_mode<synchronous>, transform_indices = @transform_0, window_bounds = array<i64: 64, 4>}, {pipeline_mode = #tpu.pipeline_mode<synchronous>, transform_indices = @transform_1, window_bounds = array<i64: 4, 128>}, {pipeline_mode = #tpu.pipeline_mode<synchronous>, transform_indices = @transform_2, window_bounds = array<i64: 32, 128>}, {pipeline_mode = #tpu.pipeline_mode<synchronous>, transform_indices = @transform_3, window_bounds = array<i64: 1, 128>}, {pipeline_mode = #tpu.pipeline_mode<synchronous>, transform_indices = @transform_4, window_bounds = array<i64: 1, 128>}, {pipeline_mode = #tpu.pipeline_mode<synchronous>, transform_indices = @transform_5, window_bounds = array<i64: 1, 128>}, {pipeline_mode = #tpu.pipeline_mode<synchronous>, transform_indices = @transform_6, window_bounds = array<i64: 8, 256>}, {pipeline_mode = #tpu.pipeline_mode<synchronous>, transform_indices = @transform_7, window_bounds = array<i64: 8, 32>}, {pipeline_mode = #tpu.pipeline_mode<synchronous>, transform_indices = @transform_8, window_bounds = array<i64: 8, 32>}]} {
    %c0 = arith.constant 0 : index
    %c0_0 = arith.constant 0 : index
    %0 = vector.load %arg1[%c0, %c0_0] : memref<64x4xf32, #tpu.memory_space<vmem>>, vector<64x4xf32>
    %c0_1 = arith.constant 0 : index
    %c0_2 = arith.constant 0 : index
    %1 = vector.load %arg2[%c0_1, %c0_2] : memref<4x128xf32, #tpu.memory_space<vmem>>, vector<4x128xf32>
    %cst = arith.constant dense<0.000000e+00> : vector<64x128xf32>
    %2 = tpu.matmul %0, %1, %cst {dimension_numbers = #tpu.dot_dimension_numbers<[1], [0], [0], [1], [0, 0, 1, 1], [], []>} : vector<64x4xf32>, vector<4x128xf32>, vector<64x128xf32> -> vector<64x128xf32>
    %c0_3 = arith.constant 0 : index
    %c0_4 = arith.constant 0 : index
    %3 = vector.load %arg4[%c0_3, %c0_4] : memref<1x128xf32, #tpu.memory_space<vmem>>, vector<1x128xf32>
    %4 = vector.broadcast %3 : vector<1x128xf32> to vector<64x128xf32>
    %5 = arith.addf %2, %4 : vector<64x128xf32>
    %c0_5 = arith.constant 0 : index
    %c0_6 = arith.constant 0 : index
    %6 = vector.load %arg3[%c0_5, %c0_6] : memref<32x128xf32, #tpu.memory_space<vmem>>, vector<32x128xf32>
    %c0_7 = arith.constant 0 : index
    %c0_8 = arith.constant 0 : index
    %7 = vector.load %arg5[%c0_7, %c0_8] : memref<1x128xf32, #tpu.memory_space<vmem>>, vector<1x128xf32>
    %8 = vector.shape_cast %7 : vector<1x128xf32> to vector<1x128xf32>
    %9 = vector.broadcast %8 : vector<1x128xf32> to vector<8x128xf32>
    %c0_9 = arith.constant 0 : index
    %c0_10 = arith.constant 0 : index
    %10 = vector.load %arg6[%c0_9, %c0_10] : memref<1x128xf32, #tpu.memory_space<vmem>>, vector<1x128xf32>
    %11 = vector.shape_cast %10 : vector<1x128xf32> to vector<1x128xf32>
    %12 = vector.broadcast %11 : vector<1x128xf32> to vector<8x128xf32>
    %cst_11 = arith.constant 0.000000e+00 : f32
    %13 = vector.broadcast %cst_11 : f32 to vector<8x32xf32>
    %cst_12 = arith.constant 0.000000e+00 : f32
    %14 = vector.broadcast %cst_12 : f32 to vector<8x32xf32>
    %15 = vector.extract_strided_slice %5 {offsets = [0, 0], sizes = [8, 128], strides = [1, 1]} : vector<64x128xf32> to vector<8x128xf32>
    %cst_13 = arith.constant dense<0.000000e+00> : vector<8x128xf32>
    %16 = tpu.matmul %13, %6, %cst_13 {dimension_numbers = #tpu.dot_dimension_numbers<[1], [0], [0], [1], [0, 0, 1, 1], [], []>} : vector<8x32xf32>, vector<32x128xf32>, vector<8x128xf32> -> vector<8x128xf32>
    %17 = arith.addf %15, %16 : vector<8x128xf32>
    %18 = arith.mulf %17, %9 : vector<8x128xf32>
    %19 = math.tanh %18 : vector<8x128xf32>
    %20 = arith.mulf %19, %9 : vector<8x128xf32>
    %21 = arith.addf %20, %12 : vector<8x128xf32>
    %22 = vector.extract_strided_slice %21 {offsets = [0, 0], sizes = [8, 32], strides = [1, 1]} : vector<8x128xf32> to vector<8x32xf32>
    %23 = vector.extract_strided_slice %21 {offsets = [0, 32], sizes = [8, 32], strides = [1, 1]} : vector<8x128xf32> to vector<8x32xf32>
    %24 = vector.extract_strided_slice %21 {offsets = [0, 64], sizes = [8, 32], strides = [1, 1]} : vector<8x128xf32> to vector<8x32xf32>
    %25 = vector.extract_strided_slice %21 {offsets = [0, 96], sizes = [8, 32], strides = [1, 1]} : vector<8x128xf32> to vector<8x32xf32>
    %26 = arith.mulf %23, %14 : vector<8x32xf32>
    %27 = arith.mulf %22, %24 : vector<8x32xf32>
    %28 = arith.addf %26, %27 : vector<8x32xf32>
    %29 = math.tanh %28 : vector<8x32xf32>
    %30 = arith.mulf %25, %29 : vector<8x32xf32>
    %31 = vector.extract_strided_slice %5 {offsets = [8, 0], sizes = [8, 128], strides = [1, 1]} : vector<64x128xf32> to vector<8x128xf32>
    %cst_14 = arith.constant dense<0.000000e+00> : vector<8x128xf32>
    %32 = tpu.matmul %30, %6, %cst_14 {dimension_numbers = #tpu.dot_dimension_numbers<[1], [0], [0], [1], [0, 0, 1, 1], [], []>} : vector<8x32xf32>, vector<32x128xf32>, vector<8x128xf32> -> vector<8x128xf32>
    %33 = arith.addf %31, %32 : vector<8x128xf32>
    %34 = arith.mulf %33, %9 : vector<8x128xf32>
    %35 = math.tanh %34 : vector<8x128xf32>
    %36 = arith.mulf %35, %9 : vector<8x128xf32>
    %37 = arith.addf %36, %12 : vector<8x128xf32>
    %38 = vector.extract_strided_slice %37 {offsets = [0, 0], sizes = [8, 32], strides = [1, 1]} : vector<8x128xf32> to vector<8x32xf32>
    %39 = vector.extract_strided_slice %37 {offsets = [0, 32], sizes = [8, 32], strides = [1, 1]} : vector<8x128xf32> to vector<8x32xf32>
    %40 = vector.extract_strided_slice %37 {offsets = [0, 64], sizes = [8, 32], strides = [1, 1]} : vector<8x128xf32> to vector<8x32xf32>
    %41 = vector.extract_strided_slice %37 {offsets = [0, 96], sizes = [8, 32], strides = [1, 1]} : vector<8x128xf32> to vector<8x32xf32>
    %42 = arith.mulf %39, %28 : vector<8x32xf32>
    %43 = arith.mulf %38, %40 : vector<8x32xf32>
    %44 = arith.addf %42, %43 : vector<8x32xf32>
    %45 = math.tanh %44 : vector<8x32xf32>
    %46 = arith.mulf %41, %45 : vector<8x32xf32>
    %47 = vector.extract_strided_slice %5 {offsets = [16, 0], sizes = [8, 128], strides = [1, 1]} : vector<64x128xf32> to vector<8x128xf32>
    %cst_15 = arith.constant dense<0.000000e+00> : vector<8x128xf32>
    %48 = tpu.matmul %46, %6, %cst_15 {dimension_numbers = #tpu.dot_dimension_numbers<[1], [0], [0], [1], [0, 0, 1, 1], [], []>} : vector<8x32xf32>, vector<32x128xf32>, vector<8x128xf32> -> vector<8x128xf32>
    %49 = arith.addf %47, %48 : vector<8x128xf32>
    %50 = arith.mulf %49, %9 : vector<8x128xf32>
    %51 = math.tanh %50 : vector<8x128xf32>
    %52 = arith.mulf %51, %9 : vector<8x128xf32>
    %53 = arith.addf %52, %12 : vector<8x128xf32>
    %54 = vector.extract_strided_slice %53 {offsets = [0, 0], sizes = [8, 32], strides = [1, 1]} : vector<8x128xf32> to vector<8x32xf32>
    %55 = vector.extract_strided_slice %53 {offsets = [0, 32], sizes = [8, 32], strides = [1, 1]} : vector<8x128xf32> to vector<8x32xf32>
    %56 = vector.extract_strided_slice %53 {offsets = [0, 64], sizes = [8, 32], strides = [1, 1]} : vector<8x128xf32> to vector<8x32xf32>
    %57 = vector.extract_strided_slice %53 {offsets = [0, 96], sizes = [8, 32], strides = [1, 1]} : vector<8x128xf32> to vector<8x32xf32>
    %58 = arith.mulf %55, %44 : vector<8x32xf32>
    %59 = arith.mulf %54, %56 : vector<8x32xf32>
    %60 = arith.addf %58, %59 : vector<8x32xf32>
    %61 = math.tanh %60 : vector<8x32xf32>
    %62 = arith.mulf %57, %61 : vector<8x32xf32>
    %63 = vector.extract_strided_slice %5 {offsets = [24, 0], sizes = [8, 128], strides = [1, 1]} : vector<64x128xf32> to vector<8x128xf32>
    %cst_16 = arith.constant dense<0.000000e+00> : vector<8x128xf32>
    %64 = tpu.matmul %62, %6, %cst_16 {dimension_numbers = #tpu.dot_dimension_numbers<[1], [0], [0], [1], [0, 0, 1, 1], [], []>} : vector<8x32xf32>, vector<32x128xf32>, vector<8x128xf32> -> vector<8x128xf32>
    %65 = arith.addf %63, %64 : vector<8x128xf32>
    %66 = arith.mulf %65, %9 : vector<8x128xf32>
    %67 = math.tanh %66 : vector<8x128xf32>
    %68 = arith.mulf %67, %9 : vector<8x128xf32>
    %69 = arith.addf %68, %12 : vector<8x128xf32>
    %70 = vector.extract_strided_slice %69 {offsets = [0, 0], sizes = [8, 32], strides = [1, 1]} : vector<8x128xf32> to vector<8x32xf32>
    %71 = vector.extract_strided_slice %69 {offsets = [0, 32], sizes = [8, 32], strides = [1, 1]} : vector<8x128xf32> to vector<8x32xf32>
    %72 = vector.extract_strided_slice %69 {offsets = [0, 64], sizes = [8, 32], strides = [1, 1]} : vector<8x128xf32> to vector<8x32xf32>
    %73 = vector.extract_strided_slice %69 {offsets = [0, 96], sizes = [8, 32], strides = [1, 1]} : vector<8x128xf32> to vector<8x32xf32>
    %74 = arith.mulf %71, %60 : vector<8x32xf32>
    %75 = arith.mulf %70, %72 : vector<8x32xf32>
    %76 = arith.addf %74, %75 : vector<8x32xf32>
    %77 = math.tanh %76 : vector<8x32xf32>
    %78 = arith.mulf %73, %77 : vector<8x32xf32>
    %79 = vector.extract_strided_slice %5 {offsets = [32, 0], sizes = [8, 128], strides = [1, 1]} : vector<64x128xf32> to vector<8x128xf32>
    %cst_17 = arith.constant dense<0.000000e+00> : vector<8x128xf32>
    %80 = tpu.matmul %78, %6, %cst_17 {dimension_numbers = #tpu.dot_dimension_numbers<[1], [0], [0], [1], [0, 0, 1, 1], [], []>} : vector<8x32xf32>, vector<32x128xf32>, vector<8x128xf32> -> vector<8x128xf32>
    %81 = arith.addf %79, %80 : vector<8x128xf32>
    %82 = arith.mulf %81, %9 : vector<8x128xf32>
    %83 = math.tanh %82 : vector<8x128xf32>
    %84 = arith.mulf %83, %9 : vector<8x128xf32>
    %85 = arith.addf %84, %12 : vector<8x128xf32>
    %86 = vector.extract_strided_slice %85 {offsets = [0, 0], sizes = [8, 32], strides = [1, 1]} : vector<8x128xf32> to vector<8x32xf32>
    %87 = vector.extract_strided_slice %85 {offsets = [0, 32], sizes = [8, 32], strides = [1, 1]} : vector<8x128xf32> to vector<8x32xf32>
    %88 = vector.extract_strided_slice %85 {offsets = [0, 64], sizes = [8, 32], strides = [1, 1]} : vector<8x128xf32> to vector<8x32xf32>
    %89 = vector.extract_strided_slice %85 {offsets = [0, 96], sizes = [8, 32], strides = [1, 1]} : vector<8x128xf32> to vector<8x32xf32>
    %90 = arith.mulf %87, %76 : vector<8x32xf32>
    %91 = arith.mulf %86, %88 : vector<8x32xf32>
    %92 = arith.addf %90, %91 : vector<8x32xf32>
    %93 = math.tanh %92 : vector<8x32xf32>
    %94 = arith.mulf %89, %93 : vector<8x32xf32>
    %95 = vector.extract_strided_slice %5 {offsets = [40, 0], sizes = [8, 128], strides = [1, 1]} : vector<64x128xf32> to vector<8x128xf32>
    %cst_18 = arith.constant dense<0.000000e+00> : vector<8x128xf32>
    %96 = tpu.matmul %94, %6, %cst_18 {dimension_numbers = #tpu.dot_dimension_numbers<[1], [0], [0], [1], [0, 0, 1, 1], [], []>} : vector<8x32xf32>, vector<32x128xf32>, vector<8x128xf32> -> vector<8x128xf32>
    %97 = arith.addf %95, %96 : vector<8x128xf32>
    %98 = arith.mulf %97, %9 : vector<8x128xf32>
    %99 = math.tanh %98 : vector<8x128xf32>
    %100 = arith.mulf %99, %9 : vector<8x128xf32>
    %101 = arith.addf %100, %12 : vector<8x128xf32>
    %102 = vector.extract_strided_slice %101 {offsets = [0, 0], sizes = [8, 32], strides = [1, 1]} : vector<8x128xf32> to vector<8x32xf32>
    %103 = vector.extract_strided_slice %101 {offsets = [0, 32], sizes = [8, 32], strides = [1, 1]} : vector<8x128xf32> to vector<8x32xf32>
    %104 = vector.extract_strided_slice %101 {offsets = [0, 64], sizes = [8, 32], strides = [1, 1]} : vector<8x128xf32> to vector<8x32xf32>
    %105 = vector.extract_strided_slice %101 {offsets = [0, 96], sizes = [8, 32], strides = [1, 1]} : vector<8x128xf32> to vector<8x32xf32>
    %106 = arith.mulf %103, %92 : vector<8x32xf32>
    %107 = arith.mulf %102, %104 : vector<8x32xf32>
    %108 = arith.addf %106, %107 : vector<8x32xf32>
    %109 = math.tanh %108 : vector<8x32xf32>
    %110 = arith.mulf %105, %109 : vector<8x32xf32>
    %111 = vector.extract_strided_slice %5 {offsets = [48, 0], sizes = [8, 128], strides = [1, 1]} : vector<64x128xf32> to vector<8x128xf32>
    %cst_19 = arith.constant dense<0.000000e+00> : vector<8x128xf32>
    %112 = tpu.matmul %110, %6, %cst_19 {dimension_numbers = #tpu.dot_dimension_numbers<[1], [0], [0], [1], [0, 0, 1, 1], [], []>} : vector<8x32xf32>, vector<32x128xf32>, vector<8x128xf32> -> vector<8x128xf32>
    %113 = arith.addf %111, %112 : vector<8x128xf32>
    %114 = arith.mulf %113, %9 : vector<8x128xf32>
    %115 = math.tanh %114 : vector<8x128xf32>
    %116 = arith.mulf %115, %9 : vector<8x128xf32>
    %117 = arith.addf %116, %12 : vector<8x128xf32>
    %118 = vector.extract_strided_slice %117 {offsets = [0, 0], sizes = [8, 32], strides = [1, 1]} : vector<8x128xf32> to vector<8x32xf32>
    %119 = vector.extract_strided_slice %117 {offsets = [0, 32], sizes = [8, 32], strides = [1, 1]} : vector<8x128xf32> to vector<8x32xf32>
    %120 = vector.extract_strided_slice %117 {offsets = [0, 64], sizes = [8, 32], strides = [1, 1]} : vector<8x128xf32> to vector<8x32xf32>
    %121 = vector.extract_strided_slice %117 {offsets = [0, 96], sizes = [8, 32], strides = [1, 1]} : vector<8x128xf32> to vector<8x32xf32>
    %122 = arith.mulf %119, %108 : vector<8x32xf32>
    %123 = arith.mulf %118, %120 : vector<8x32xf32>
    %124 = arith.addf %122, %123 : vector<8x32xf32>
    %125 = math.tanh %124 : vector<8x32xf32>
    %126 = arith.mulf %121, %125 : vector<8x32xf32>
    %127 = vector.extract_strided_slice %5 {offsets = [56, 0], sizes = [8, 128], strides = [1, 1]} : vector<64x128xf32> to vector<8x128xf32>
    %cst_20 = arith.constant dense<0.000000e+00> : vector<8x128xf32>
    %128 = tpu.matmul %126, %6, %cst_20 {dimension_numbers = #tpu.dot_dimension_numbers<[1], [0], [0], [1], [0, 0, 1, 1], [], []>} : vector<8x32xf32>, vector<32x128xf32>, vector<8x128xf32> -> vector<8x128xf32>
    %129 = arith.addf %127, %128 : vector<8x128xf32>
    %130 = arith.mulf %129, %9 : vector<8x128xf32>
    %131 = math.tanh %130 : vector<8x128xf32>
    %132 = arith.mulf %131, %9 : vector<8x128xf32>
    %133 = arith.addf %132, %12 : vector<8x128xf32>
    %134 = vector.extract_strided_slice %133 {offsets = [0, 0], sizes = [8, 32], strides = [1, 1]} : vector<8x128xf32> to vector<8x32xf32>
    %135 = vector.extract_strided_slice %133 {offsets = [0, 32], sizes = [8, 32], strides = [1, 1]} : vector<8x128xf32> to vector<8x32xf32>
    %136 = vector.extract_strided_slice %133 {offsets = [0, 64], sizes = [8, 32], strides = [1, 1]} : vector<8x128xf32> to vector<8x32xf32>
    %137 = vector.extract_strided_slice %133 {offsets = [0, 96], sizes = [8, 32], strides = [1, 1]} : vector<8x128xf32> to vector<8x32xf32>
    %138 = arith.mulf %135, %124 : vector<8x32xf32>
    %139 = arith.mulf %134, %136 : vector<8x32xf32>
    %140 = arith.addf %138, %139 : vector<8x32xf32>
    %141 = math.tanh %140 : vector<8x32xf32>
    %142 = arith.mulf %137, %141 : vector<8x32xf32>
    %143 = tpu.concatenate %30, %46, %62, %78, %94, %110, %126, %142 in 1 : vector<8x32xf32>, vector<8x32xf32>, vector<8x32xf32>, vector<8x32xf32>, vector<8x32xf32>, vector<8x32xf32>, vector<8x32xf32>, vector<8x32xf32> -> vector<8x256xf32>
    %c0_21 = arith.constant 0 : index
    %c0_22 = arith.constant 0 : index
    %144 = vector.load %arg7[%c0_21, %c0_22] : memref<8x256xf32, #tpu.memory_space<vmem>>, vector<8x256xf32>
    tpu.vector_store %arg7[%c0_21, %c0_22], %143 {strides = array<i32>} : memref<8x256xf32, #tpu.memory_space<vmem>>, vector<8x256xf32>,
    %c0_23 = arith.constant 0 : index
    %c0_24 = arith.constant 0 : index
    %145 = vector.load %arg8[%c0_23, %c0_24] : memref<8x32xf32, #tpu.memory_space<vmem>>, vector<8x32xf32>
    tpu.vector_store %arg8[%c0_23, %c0_24], %142 {strides = array<i32>} : memref<8x32xf32, #tpu.memory_space<vmem>>, vector<8x32xf32>,
    %c0_25 = arith.constant 0 : index
    %c0_26 = arith.constant 0 : index
    %146 = vector.load %arg9[%c0_25, %c0_26] : memref<8x32xf32, #tpu.memory_space<vmem>>, vector<8x32xf32>
    tpu.vector_store %arg9[%c0_25, %c0_26], %140 {strides = array<i32>} : memref<8x32xf32, #tpu.memory_space<vmem>>, vector<8x32xf32>,
    return
  }
  func.func @transform_0(%arg0: i32) -> (i32, i32) {
    %c0_i32 = arith.constant 0 : i32
    %c0_i32_0 = arith.constant 0 : i32
    %c0_i32_1 = arith.constant 0 : i32
    return %c0_i32, %c0_i32_0 : i32, i32
  }
  func.func @transform_1(%arg0: i32) -> (i32, i32) {
    %c0_i32 = arith.constant 0 : i32
    %c0_i32_0 = arith.constant 0 : i32
    %c0_i32_1 = arith.constant 0 : i32
    return %c0_i32, %c0_i32_0 : i32, i32
  }
  func.func @transform_2(%arg0: i32) -> (i32, i32) {
    %c0_i32 = arith.constant 0 : i32
    %c0_i32_0 = arith.constant 0 : i32
    %c0_i32_1 = arith.constant 0 : i32
    return %c0_i32, %c0_i32_0 : i32, i32
  }
  func.func @transform_3(%arg0: i32) -> (i32, i32) {
    %c0_i32 = arith.constant 0 : i32
    %c0_i32_0 = arith.constant 0 : i32
    %c0_i32_1 = arith.constant 0 : i32
    return %c0_i32, %c0_i32_0 : i32, i32
  }
  func.func @transform_4(%arg0: i32) -> (i32, i32) {
    %c0_i32 = arith.constant 0 : i32
    %c0_i32_0 = arith.constant 0 : i32
    %c0_i32_1 = arith.constant 0 : i32
    return %c0_i32, %c0_i32_0 : i32, i32
  }
  func.func @transform_5(%arg0: i32) -> (i32, i32) {
    %c0_i32 = arith.constant 0 : i32
    %c0_i32_0 = arith.constant 0 : i32
    %c0_i32_1 = arith.constant 0 : i32
    return %c0_i32, %c0_i32_0 : i32, i32
  }
  func.func @transform_6(%arg0: i32) -> (i32, i32) {
    %c0_i32 = arith.constant 0 : i32
    %c0_i32_0 = arith.constant 0 : i32
    %c0_i32_1 = arith.constant 0 : i32
    return %c0_i32, %c0_i32_0 : i32, i32
  }
  func.func @transform_7(%arg0: i32) -> (i32, i32) {
    %c0_i32 = arith.constant 0 : i32
    %c0_i32_0 = arith.constant 0 : i32
    %c0_i32_1 = arith.constant 0 : i32
    return %c0_i32, %c0_i32_0 : i32, i32
  }
  func.func @transform_8(%arg0: i32) -> (i32, i32) {
    %c0_i32 = arith.constant 0 : i32
    %c0_i32_0 = arith.constant 0 : i32
    %c0_i32_1 = arith.constant 0 : i32
    return %c0_i32, %c0_i32_0 : i32, i32
  }
}

</mosaic_0001>

<bundles_post_ra>
// kernel: tpu_custom_call.1
= control target key start
LH: loop header
LB: loop body
LE: loop exit
PB: predicated region body
PF: predicated region fallthrough
CT: control target
= control target key end

     0   :  { %14 = vsyncpa [#allocation3], 0  ;;  %vm66_vm0 = vcmask 1043456   ;;  %vm41_vm1 = vcmask 31744   ;;  %s983_s0 = inlined_call_operand.vmem [shape: f32[64,4], index: 0, kind: input, shape index: {}]   ;;  %s984_s1 = inlined_call_operand.vmem [shape: f32[4,128], index: 1, kind: input, shape index: {}]   ;;  %s985_s2 = inlined_call_operand.vmem [shape: f32[32,128], index: 2, kind: input, shape index: {}]   ;;  %s986_s3 = inlined_call_operand.vmem [shape: f32[1,128], index: 3, kind: input, shape index: {}]   ;;  %s987_s4 = inlined_call_operand.vmem [shape: f32[1,128], index: 4, kind: input, shape index: {}]   ;;  %s988_s5 = inlined_call_operand.vmem [shape: f32[1,128], index: 5, kind: input, shape index: {}]   ;;  %s989_s6 = inlined_call_operand.hbm [shape: f32[8,256], index: 6, kind: output, shape index: {0}]   ;;  %s990_s7 = inlined_call_operand.hbm [shape: f32[8,32], index: 7, kind: output, shape index: {1}]   ;;  %s991_s8 = inlined_call_operand.hbm [shape: f32[8,32], index: 8, kind: output, shape index: {2}]  }
   0x1   :  { %v769_v0 = vld [vmem:[%s985_s2 + $0x18] sm:$0xff]  ;;  %v774_v1 = vld [vmem:[%s985_s2 + $0x10] sm:$0xff]  ;;  %v36_v2 = vld [vmem:[%s984_s1] sm:$0xf] }
   0x2   :  { %139 = vmatpush.msra.mxu1 %v769_v0  ;;  %579 = vmatpush.msk.msra.mxu0 %vm66_vm0, %v36_v2  ;;  %v28_v3 = vld [vmem:[%s983_s0] sm:$0xff]  ;;  %v786_v4 = vld [vmem:[%s985_s2 + $0x8] sm:$0xff] }
   0x3   :  { %580 = vmatmul.msk.f32.vlgmr.msra.gmra.mxu0 %vm41_vm1, %v28_v3  ;;  %186 = vmatpush.msra.mxu2 %v769_v0 }
   0x4   :  { %140 = vmatpush.msra.mxu1 %v774_v1  ;;  %595 = vmatpush.msk.msra.mxu3 %vm66_vm0, %v36_v2 }
   0x5   :  { %15 = vsyncpa [#allocation5], 0  ;;  %v794_v5 = vld [vmem:[%s985_s2] sm:$0xff]  ;;  %187 = vmatpush.msra.mxu2 %v774_v1  ;;  %v714_v6 = vmov 0.0   ;;  %v29_v26 = vld [vmem:[%s983_s0 + $0x8] sm:$0xff]  ;;  %vm123_vm2 = vcmask 261120  }
   0x6   :  { %233 = vmatpush.msrb.mxu3 %v769_v0  ;;  %141 = vmatpush.msra.mxu1 %v786_v4  ;;  %v820_v7 = vld [vmem:[%s986_s3] ss:$0 sm:$0xff]  ;;  %s715_s3 = smov 64   ;;  %v33_v42 = vld [vmem:[%s983_s0 + $0x28] sm:$0xff]  ;;  %v34_v43 = vld [vmem:[%s983_s0 + $0x30] sm:$0xff]  ;;  %vm513_vm3 = vcmask 523264  }
   0x7   :  { %188 = vmatpush.msra.mxu2 %v786_v4  ;;  %v826_v10 = vld [vmem:[%s987_s4] ss:$0 sm:$0xff]  ;;  %s716_s4 = smov 32   ;;  %585 = vmatmul.msk.f32.vlgmr.msra.gmra.mxu3 %vm41_vm1, %v33_v42  ;;  %v35_v44 = vld [vmem:[%s983_s0 + $0x38] sm:$0xff]  ;;  %v30_v47 = vld [vmem:[%s983_s0 + $0x10] sm:$0xff]  ;;  %vm515_vm4 = vcmask 785408  }
   0x8   :  { %234 = vmatpush.msrb.mxu3 %v774_v1  ;;  %142 = vmatpush.msra.mxu1 %v794_v5  ;;  %v832_v14 = vld [vmem:[%s988_s5] ss:$0 sm:$0xff]  ;;  %v31_v2 = vld [vmem:[%s983_s0 + $0x18] sm:$0xff]  ;;  %s718_s12 = smov [#allocation2]   ;;  %s539_s15 = sshll.u32 %s989_s6, 4  ;;  %s540_s15 = int_to_ptr.hbm [resolvable:$true] %s539_s15 }
   0x9   :  { %143 = vmatmul.f32.vlgmr.msra.gmra.mxu1 %v714_v6  ;;  %189 = vmatpush.msra.mxu2 %v794_v5  ;;  %s537_s13 = sshll.u32 %s718_s12, 4  ;;  %s719_s2 = smov [#allocation4]   ;;  %s538_s13 = int_to_ptr.vmem [resolvable:$true] %s537_s13 }
   0xa   :  { %235 = vmatpush.msrb.mxu3 %v786_v4  ;;  %280 = vmatpush.msrb.mxu1 %v769_v0  ;;  %s548_s16 = sshll.u32 %s719_s2, 4  ;;  %s550_s6 = sshll.u32 %s990_s7, 4  ;;  %s549_s16 = int_to_ptr.vmem [resolvable:$true] %s548_s16  ;;  %s551_s6 = int_to_ptr.hbm [resolvable:$true] %s550_s6 }
   0xb   :  { %327 = vmatpush.msrb.mxu2 %v769_v0  ;;  %581 = vmatmul.msk.f32.gmra.mxu0 %vm41_vm1, %v29_v26  ;;  %s720_s19 = smov [#allocation6]   ;;  %s561_s5 = sshll.u32 %s991_s8, 4  ;;  %s562_s5 = int_to_ptr.hbm [resolvable:$true] %s561_s5 }
   0xc   :  { %236 = vmatpush.msrb.mxu3 %v794_v5  ;;  %281 = vmatpush.msrb.mxu1 %v774_v1  ;;  %s559_s20 = sshll.u32 %s720_s19, 4  ;;  %s560_s20 = int_to_ptr.vmem [resolvable:$true] %s559_s20 }
   0xd   :  { %328 = vmatpush.msrb.mxu2 %v774_v1 }
   0xe   :  { %282 = vmatpush.msrb.mxu1 %v786_v4  ;;  %374 = vmatpush.msra.mxu3 %v769_v0 }
   0xf   :  { %329 = vmatpush.msrb.mxu2 %v786_v4  ;;  %586 = vmatmul.msk.f32.gmra.mxu3 %vm41_vm1, %v34_v43 }
  0x10   :  { %283 = vmatpush.msrb.mxu1 %v794_v5  ;;  %375 = vmatpush.msra.mxu3 %v774_v1 }
  0x11   :  { %330 = vmatpush.msrb.mxu2 %v794_v5 }
  0x12   :  { %421 = vmatpush.msra.mxu1 %v769_v0  ;;  %376 = vmatpush.msra.mxu3 %v786_v4 }
  0x13   :  { %582 = vmatmul.msk.f32.gmra.mxu0 %vm41_vm1, %v30_v47 }
  0x14   :  { %422 = vmatpush.msra.mxu1 %v774_v1  ;;  %377 = vmatpush.msra.mxu3 %v794_v5 }
  0x16   :  { %423 = vmatpush.msra.mxu1 %v786_v4 }
  0x17   :  { %587 = vmatmul.msk.f32.gmra.mxu3 %vm41_vm1, %v35_v44 }
  0x18   :  { %424 = vmatpush.msra.mxu1 %v794_v5 }
  0x1b   :  { %583 = vmatmul.msk.f32.gmra.mxu0 %vm41_vm1, %v31_v2 }
  0x80   :  { %v87_v8 = vpop.f32.mrf.mxu0 }
  0x81   :  { %v88_v9 = vadd.f32 %v820_v7, %v87_v8 }
  0x86   :  { %v144_v11 = vpop.f32.mrf.mxu1 }
  0x87   :  { %v147_v12 = vadd.f32 %v144_v11, %v88_v9 }
  0x88   :  { %v90_v28 = vpop.f32.mrf.mxu0 }
  0x89   :  { %v148_v13 = vmul.f32 %v826_v10, %v147_v12  ;;  %v91_v29 = vadd.f32 %v820_v7, %v90_v28 }
  0x8a   :  { %v884_v49 = vpop.f32.mrf.mxu3 }
  0x8b   :  { %606 = vtanh.f32 %v148_v13 }
  0x90   :  { %v93_v52 = vpop.f32.mrf.mxu0 }
  0x91   :  { %v607_v15 = vpop.eup %606  ;;  %v94_v53 = vadd.f32 %v820_v7, %v93_v52 }
  0x92   :  { %v150_v16 = vmul.f32 %v607_v15, %v826_v10  ;;  %v886_v50 = vpop.f32.mrf.mxu3 }
  0x94   :  { %v151_v17 = vadd.f32 %v832_v14, %v150_v16 }
  0x96   :  { %154 = vrot.lane.b32.xlu0 %v151_v17, %s715_s3  ;;  %v152_v20 = vmul.f32 0.0, %v151_v17 }
  0x98   :  { %v96_v6 = vpop.f32.mrf.mxu0 }
  0x99   :  { %v97_v8 = vadd.f32 %v820_v7, %v96_v6 }
  0x9a   :  { %v888_v51 = vpop.f32.mrf.mxu3 }
 0x108   :  { %v155_v18 = vpop.permute.xlu0 %154 }
 0x109   :  { %v157_v19 = vmul.f32 %v155_v18, %v151_v17 }
 0x10b   :  { %159 = vrot.lane.b32.xlu0 %v157_v19, %s716_s4 }
 0x17d   :  { %v160_v21 = vpop.permute.xlu0 %159 }
 0x17e   :  { %v162_v22 = vadd.f32 %v160_v21, %v152_v20 }
 0x180   :  { %608 = vtanh.f32 %v162_v22 }
 0x186   :  { %v609_v23 = vpop.eup %608 }
 0x187   :  { %165 = vrot.lane.b32.xlu1 %v609_v23, %s715_s3 }
 0x1f9   :  { %v166_v24 = vpop.permute.xlu1 %165 }
 0x1fa   :  { %v168_v25 = vmul.f32 %v166_v24, %v151_v17 }
 0x1fc   :  { %170 = vrot.lane.b32.xlu1 %v168_v25, %s716_s4  ;;  %v32_v25 = vld [vmem:[%s983_s0 + $0x20] sm:$0xff]  ;;  %s717_s0 = smov 96  }
 0x1fd   :  { %584 = vmatmul.msk.f32.gmra.mxu0 %vm41_vm1, %v32_v25 }
 0x26e   :  { %v844_v27 = vpop.permute.xlu1 %170 }
 0x26f   :  { %588 = vmatmul.msk.f32.vlgmr.msra.gmra.mxu2 %vm123_vm2, %v844_v27 }
 0x270   :  { %468 = vmatpush.msra.mxu2 %v769_v0 }
 0x272   :  { %469 = vmatpush.msra.mxu2 %v774_v1 }
 0x274   :  { %470 = vmatpush.msra.mxu2 %v786_v4 }
 0x276   :  { %471 = vmatpush.msra.mxu2 %v794_v5 }
 0x27a   :  { %v99_v28 = vpop.f32.mrf.mxu0 }
 0x2f2   :  { %v191_v30 = vpop.f32.mrf.mxu2 }
 0x2f3   :  { %v194_v31 = vadd.f32 %v191_v30, %v91_v29  ;;  %v100_v29 = vadd.f32 %v820_v7, %v99_v28 }
 0x2f5   :  { %v195_v32 = vmul.f32 %v826_v10, %v194_v31 }
 0x2f7   :  { %610 = vtanh.f32 %v195_v32 }
 0x2fd   :  { %v611_v33 = vpop.eup %610 }
 0x2fe   :  { %v197_v34 = vmul.f32 %v611_v33, %v826_v10 }
 0x300   :  { %v198_v35 = vadd.f32 %v832_v14, %v197_v34 }
 0x302   :  { %201 = vrot.lane.b32.xlu2 %v198_v35, %s715_s3  ;;  %v199_v38 = vmul.f32 %v198_v35, %v162_v22 }
 0x35c   :  { %v202_v36 = vpop.permute.xlu2 %201 }
 0x35d   :  { %v204_v37 = vmul.f32 %v202_v36, %v198_v35 }
 0x35f   :  { %206 = vrot.lane.b32.xlu2 %v204_v37, %s716_s4 }
 0x3b9   :  { %v207_v39 = vpop.permute.xlu2 %206 }
 0x3ba   :  { %v209_v40 = vadd.f32 %v207_v39, %v199_v38 }
 0x3bc   :  { %612 = vtanh.f32 %v209_v40 }
 0x3c2   :  { %v613_v41 = vpop.eup %612 }
 0x3c3   :  { %212 = vrot.lane.b32.xlu0 %v613_v41, %s715_s3 }
 0x435   :  { %v213_v45 = vpop.permute.xlu0 %212 }
 0x436   :  { %v875_v46 = vmul.f32 %v213_v45, %v198_v35  ;;  %v103_v45 = vadd.f32 %v820_v7, %v884_v49 }
 0x438   :  { %217 = vrot.lane.b32.xlu1 %v875_v46, %s716_s4 }
 0x4aa   :  { %v218_v48 = vpop.permute.xlu1 %217 }
 0x4ab   :  { %589 = vmatmul.msk.f32.vlgmr.msrb.gmra.mxu3 %vm123_vm2, %v218_v48 }
 0x52e   :  { %v238_v54 = vpop.f32.mrf.mxu3 }
 0x52f   :  { %v241_v55 = vadd.f32 %v238_v54, %v94_v53 }
 0x531   :  { %v242_v56 = vmul.f32 %v826_v10, %v241_v55 }
 0x533   :  { %614 = vtanh.f32 %v242_v56 }
 0x539   :  { %v615_v57 = vpop.eup %614 }
 0x53a   :  { %v244_v58 = vmul.f32 %v615_v57, %v826_v10 }
 0x53c   :  { %v245_v59 = vadd.f32 %v832_v14, %v244_v58 }
 0x53e   :  { %248 = vrot.lane.b32.xlu2 %v245_v59, %s715_s3  ;;  %v246_v62 = vmul.f32 %v245_v59, %v209_v40 }
 0x598   :  { %v249_v60 = vpop.permute.xlu2 %248 }
 0x599   :  { %v251_v61 = vmul.f32 %v249_v60, %v245_v59 }
 0x59b   :  { %253 = vrot.lane.b32.xlu0 %v251_v61, %s716_s4 }
 0x60d   :  { %v254_v63 = vpop.permute.xlu0 %253 }
 0x60e   :  { %v256_v0 = vadd.f32 %v254_v63, %v246_v62 }
 0x610   :  { %616 = vtanh.f32 %v256_v0 }
 0x616   :  { %v617_v1 = vpop.eup %616 }
 0x617   :  { %259 = vrot.lane.b32.xlu1 %v617_v1, %s715_s3 }
 0x689   :  { %v260_v3 = vpop.permute.xlu1 %259 }
 0x68a   :  { %v901_v4 = vmul.f32 %v260_v3, %v245_v59 }
 0x68c   :  { %264 = vrot.lane.b32.xlu2 %v901_v4, %s716_s4 }
 0x6e6   :  { %v265_v5 = vpop.permute.xlu2 %264 }
 0x6e7   :  { %590 = vmatmul.msk.f32.vlgmr.msrb.gmra.mxu1 %vm123_vm2, %v265_v5 }
 0x764   :  { %v285_v9 = vpop.f32.mrf.mxu1 }
 0x765   :  { %v288_v11 = vadd.f32 %v285_v9, %v97_v8 }
 0x767   :  { %v289_v12 = vmul.f32 %v826_v10, %v288_v11 }
 0x769   :  { %618 = vtanh.f32 %v289_v12 }
 0x76f   :  { %v619_v13 = vpop.eup %618 }
 0x770   :  { %v291_v15 = vmul.f32 %v619_v13, %v826_v10 }
 0x772   :  { %v292_v16 = vadd.f32 %v832_v14, %v291_v15 }
 0x774   :  { %295 = vrot.lane.b32.xlu0 %v292_v16, %s715_s3  ;;  %v293_v19 = vmul.f32 %v292_v16, %v256_v0  ;;  %v106_v0 = vadd.f32 %v820_v7, %v886_v50 }
 0x7e6   :  { %v296_v17 = vpop.permute.xlu0 %295 }
 0x7e7   :  { %v298_v18 = vmul.f32 %v296_v17, %v292_v16 }
 0x7e9   :  { %300 = vrot.lane.b32.xlu1 %v298_v18, %s716_s4 }
 0x85b   :  { %v301_v20 = vpop.permute.xlu1 %300 }
 0x85c   :  { %v303_v21 = vadd.f32 %v301_v20, %v293_v19  ;;  %v109_v19 = vadd.f32 %v820_v7, %v888_v51 }
 0x85e   :  { %620 = vtanh.f32 %v303_v21 }
 0x864   :  { %v621_v22 = vpop.eup %620 }
 0x865   :  { %306 = vrot.lane.b32.xlu2 %v621_v22, %s715_s3 }
 0x8bf   :  { %v307_v23 = vpop.permute.xlu2 %306 }
 0x8c0   :  { %v913_v24 = vmul.f32 %v307_v23, %v292_v16 }
 0x8c2   :  { %311 = vrot.lane.b32.xlu0 %v913_v24, %s716_s4 }
 0x934   :  { %v312_v26 = vpop.permute.xlu0 %311 }
 0x935   :  { %591 = vmatmul.msk.f32.vlgmr.msrb.gmra.mxu2 %vm123_vm2, %v312_v26 }
 0x9b8   :  { %v332_v30 = vpop.f32.mrf.mxu2 }
 0x9b9   :  { %v335_v31 = vadd.f32 %v332_v30, %v100_v29 }
 0x9bb   :  { %v336_v32 = vmul.f32 %v826_v10, %v335_v31 }
 0x9bd   :  { %622 = vtanh.f32 %v336_v32 }
 0x9c3   :  { %v623_v33 = vpop.eup %622 }
 0x9c4   :  { %v338_v34 = vmul.f32 %v623_v33, %v826_v10 }
 0x9c6   :  { %v339_v35 = vadd.f32 %v832_v14, %v338_v34 }
 0x9c8   :  { %342 = vrot.lane.b32.xlu1 %v339_v35, %s715_s3  ;;  %v340_v38 = vmul.f32 %v339_v35, %v303_v21 }
 0xa3a   :  { %v343_v36 = vpop.permute.xlu1 %342 }
 0xa3b   :  { %v345_v37 = vmul.f32 %v343_v36, %v339_v35 }
 0xa3d   :  { %347 = vrot.lane.b32.xlu2 %v345_v37, %s716_s4 }
 0xa97   :  { %v348_v39 = vpop.permute.xlu2 %347 }
 0xa98   :  { %v350_v40 = vadd.f32 %v348_v39, %v340_v38 }
 0xa9a   :  { %624 = vtanh.f32 %v350_v40 }
 0xaa0   :  { %v625_v41 = vpop.eup %624 }
 0xaa1   :  { %353 = vrot.lane.b32.xlu0 %v625_v41, %s715_s3 }
 0xb13   :  { %v354_v42 = vpop.permute.xlu0 %353 }
 0xb14   :  { %v356_v43 = vmul.f32 %v354_v42, %v339_v35 }
 0xb16   :  { %358 = vrot.lane.b32.xlu1 %v356_v43, %s716_s4 }
 0xb88   :  { %v930_v44 = vpop.permute.xlu1 %358 }
 0xb89   :  { %592 = vmatmul.msk.f32.vlgmr.msra.gmra.mxu3 %vm123_vm2, %v930_v44 }
 0xc0c   :  { %v379_v47 = vpop.f32.mrf.mxu3 }
 0xc0d   :  { %v382_v48 = vadd.f32 %v379_v47, %v103_v45 }
 0xc0f   :  { %v383_v52 = vmul.f32 %v826_v10, %v382_v48 }
 0xc11   :  { %626 = vtanh.f32 %v383_v52 }
 0xc17   :  { %v627_v53 = vpop.eup %626 }
 0xc18   :  { %v385_v54 = vmul.f32 %v627_v53, %v826_v10 }
 0xc1a   :  { %v386_v55 = vadd.f32 %v832_v14, %v385_v54 }
 0xc1c   :  { %389 = vrot.lane.b32.xlu2 %v386_v55, %s715_s3  ;;  %v387_v58 = vmul.f32 %v386_v55, %v350_v40 }
 0xc76   :  { %v390_v56 = vpop.permute.xlu2 %389 }
 0xc77   :  { %v392_v57 = vmul.f32 %v390_v56, %v386_v55 }
 0xc79   :  { %394 = vrot.lane.b32.xlu0 %v392_v57, %s716_s4 }
 0xceb   :  { %v395_v59 = vpop.permute.xlu0 %394 }
 0xcec   :  { %v397_v60 = vadd.f32 %v395_v59, %v387_v58 }
 0xcee   :  { %628 = vtanh.f32 %v397_v60 }
 0xcf4   :  { %v629_v49 = vpop.eup %628 }
 0xcf5   :  { %400 = vrot.lane.b32.xlu1 %v629_v49, %s715_s3 }
 0xd67   :  { %v401_v61 = vpop.permute.xlu1 %400 }
 0xd68   :  { %v403_v62 = vmul.f32 %v401_v61, %v386_v55 }
 0xd6a   :  { %405 = vrot.lane.b32.xlu2 %v403_v62, %s716_s4 }
 0xdc4   :  { %v406_v63 = vpop.permute.xlu2 %405 }
 0xdc5   :  { %593 = vmatmul.msk.f32.vlgmr.msra.gmra.mxu1 %vm123_vm2, %v406_v63 }
 0xe42   :  { %v426_v1 = vpop.f32.mrf.mxu1 }
 0xe43   :  { %v429_v2 = vadd.f32 %v426_v1, %v106_v0 }
 0xe45   :  { %v430_v3 = vmul.f32 %v826_v10, %v429_v2 }
 0xe47   :  { %630 = vtanh.f32 %v430_v3 }
 0xe4d   :  { %v631_v5 = vpop.eup %630 }
 0xe4e   :  { %v432_v6 = vmul.f32 %v631_v5, %v826_v10 }
 0xe50   :  { %v433_v8 = vadd.f32 %v832_v14, %v432_v6 }
 0xe52   :  { %436 = vrot.lane.b32.xlu0 %v433_v8, %s715_s3  ;;  %v434_v12 = vmul.f32 %v433_v8, %v397_v60 }
 0xec4   :  { %v437_v9 = vpop.permute.xlu0 %436 }
 0xec5   :  { %v439_v11 = vmul.f32 %v437_v9, %v433_v8 }
 0xec7   :  { %441 = vrot.lane.b32.xlu1 %v439_v11, %s716_s4 }
 0xf39   :  { %v442_v13 = vpop.permute.xlu1 %441 }
 0xf3a   :  { %v444_v15 = vadd.f32 %v442_v13, %v434_v12 }
 0xf3c   :  { %632 = vtanh.f32 %v444_v15 }
 0xf42   :  { %v633_v50 = vpop.eup %632 }
 0xf43   :  { %447 = vrot.lane.b32.xlu2 %v633_v50, %s715_s3 }
 0xf9d   :  { %v448_v16 = vpop.permute.xlu2 %447 }
 0xf9e   :  { %v450_v17 = vmul.f32 %v448_v16, %v433_v8 }
 0xfa0   :  { %452 = vrot.lane.b32.xlu0 %v450_v17, %s716_s4 }
0x1012   :  { %v453_v18 = vpop.permute.xlu0 %452 }
0x1013   :  { %594 = vmatmul.msk.f32.vlgmr.msra.gmra.mxu2 %vm123_vm2, %v453_v18 }
0x1096   :  { %v473_v20 = vpop.f32.mrf.mxu2 }
0x1097   :  { %v476_v21 = vadd.f32 %v473_v20, %v109_v19 }
0x1099   :  { %v477_v22 = vmul.f32 %v826_v10, %v476_v21 }
0x109b   :  { %634 = vtanh.f32 %v477_v22 }
0x10a1   :  { %v635_v23 = vpop.eup %634 }
0x10a2   :  { %v479_v25 = vmul.f32 %v635_v23, %v826_v10 }
0x10a4   :  { %v480_v26 = vadd.f32 %v832_v14, %v479_v25 }
0x10a6   :  { %483 = vrot.lane.b32.xlu1 %v480_v26, %s715_s3  ;;  %v481_v7 = vmul.f32 %v480_v26, %v444_v15 }
0x10ae   :  { %499 = vrot.lane.b32.xlu1 %v875_v46, %s715_s3 }
0x10b6   :  { %509 = vrot.lane.b32.xlu1 %v450_v17, %s717_s0 }
0x1118   :  { %v484_v28 = vpop.permute.xlu1 %483 }
0x1119   :  { %v486_v29 = vmul.f32 %v484_v28, %v480_v26 }
0x111b   :  { %488 = vrot.lane.b32.xlu2 %v486_v29, %s716_s4 }
0x1120   :  { %v500_v14 = vpop.permute.xlu1 %499 }
0x1123   :  { %506 = vrot.lane.b32.xlu2 %v403_v62, %s715_s3 }
0x1128   :  { %v510_v33 = vpop.permute.xlu1 %509 }
0x1175   :  { %v489_v51 = vpop.permute.xlu2 %488 }
0x1176   :  { %v491_v30 = vadd.f32 %v489_v51, %v481_v7 }
0x1178   :  { %636 = vtanh.f32 %v491_v30 }
0x117d   :  { %v507_v46 = vpop.permute.xlu2 %506 }
0x117e   :  { %v637_v10 = vpop.eup %636  ;;  %v517_v31 = vsel %vm123_vm2, %v930_v44, %v507_v46 }
0x117f   :  { %494 = vrot.lane.b32.xlu0 %v637_v10, %s715_s3  ;;  %v518_v35 = vsel %vm513_vm3, %v517_v31, %v510_v33 }
0x1187   :  { %502 = vrot.lane.b32.xlu0 %v901_v4, %s717_s0  ;;  %v512_v4 = vsel %vm123_vm2, %v844_v27, %v500_v14 }
0x118f   :  { %528 = vrot.lane.b32.xlu0 %v491_v30, %s717_s0 }
0x11f1   :  { %v495_v32 = vpop.permute.xlu0 %494 }
0x11f2   :  { %v497_v34 = vmul.f32 %v495_v32, %v480_v26 }
0x11f4   :  { %523 = vrot.lane.b32.xlu2 %v497_v34, %s716_s4  ;;  %v519_v36 = vsel %vm515_vm4, %v518_v35, %v497_v34 }
0x11f5   :  { %521 = vst [vmem:[#allocation2 + $0x8] sm:$0xff] %v519_v36 }
0x11f9   :  { %v503_v37 = vpop.permute.xlu0 %502 }
0x11fa   :  { %v514_v38 = vsel %vm513_vm3, %v512_v4, %v503_v37 }
0x11fb   :  { %v516_v39 = vsel %vm515_vm4, %v514_v38, %v913_v24 }
0x11fc   :  { %520 = vst [vmem:[#allocation2] sm:$0xff] %v516_v39 }
0x11fd   :  { %542 = dma.vmem_to_hbm [thread:$0]  %s538_s13, 256, %s540_s15, [#allocation3]  }
0x1201   :  { %v529_v40 = vpop.permute.xlu0 %528 }
0x1202   :  { %531 = vst.msk [vmem:[#allocation6] sm:$0xff] %vm123_vm2, %v529_v40 }
0x124e   :  { %v524_v27 = vpop.permute.xlu2 %523 }
0x124f   :  { %526 = vst.msk [vmem:[#allocation4] sm:$0xff] %vm123_vm2, %v524_v27 }
0x1250   :  { %553 = dma.vmem_to_hbm [thread:$0]  %s549_s16, 128, %s551_s6, [#allocation5]  }
0x1251   :  { %564 = dma.vmem_to_hbm [thread:$0]  %s560_s20, 128, %s562_s5, [#allocation5]  }
0x1252   :  { %710 = dma.done.wait [#allocation3], 256  }
0x1253   :  { %711 = vsyncadd [#allocation3], 4294967040 }
0x1254   :  { %712 = dma.done.wait [#allocation5], 256  }
0x1255   :  { %713 = vsyncadd [#allocation5], 4294967040 }
0x1256   :  { %577 = vsyncpa [#allocation3], 1 }
0x1257   :  { %578 = vsyncpa [#allocation5], 1 }

</bundles_post_ra>
